<compile_context>
chip_gen: v6e
topology: v6e:2x2x1
jax: 0.10.0
libtpu: 0.0.40
codegen_flags: <defaults>
</compile_context>

<pallas_src>
import functools

import jax
import jax.numpy as jnp
from jax.experimental import pallas as pl
from jax.experimental.pallas import tpu as pltpu

BN_EPS = 1e-5


def _round_up(x, m):
    return (x + m - 1) // m * m


def critic_net_kernel(x_ref, act_ref, wslab_ref, vec_ref, out_ref, *,
                      state_space, action_space, hidden1, hidden2, s_pad):
    H1, H2 = hidden1, hidden2

    # ---- unpack packed f32 per-feature vector (all offsets multiples of 128) ----
    gamma = vec_ref[:, pl.ds(0, H1)]                     # (1, H1)
    beta = vec_ref[:, pl.ds(H1, H1)]                     # (1, H1)
    b2 = vec_ref[:, pl.ds(2 * H1, H2)]                   # (1, H2)
    w3_row = vec_ref[:, pl.ds(2 * H1 + H2, H2)]          # (1, H2)  fc_2m weight row (f32)
    b3 = vec_ref[:, pl.ds(2 * H1 + 2 * H2, 1)]           # (1, 1)

    # ---- slice the packed bf16 weight slab (sublane offsets multiples of 16) ----
    w1 = wslab_ref[pl.ds(0, state_space), pl.ds(0, H1)]                 # (S,  H1)
    w2s = wslab_ref[pl.ds(s_pad, H1), pl.ds(0, H2)]                     # (H1, H2)
    w2a = wslab_ref[pl.ds(s_pad + H1, action_space), pl.ds(0, H2)]      # (A,  H2)

    # ---- fc_1s (bias dropped: cancelled by BN mean subtraction) ----
    x = x_ref[...].astype(jnp.bfloat16)                                 # (B, S)
    h1 = jnp.dot(x, w1, preferred_element_type=jnp.float32)             # (B, H1) f32

    # ---- BatchNorm1d, training mode, one-pass stats (two independent reduces) ----
    inv_n = 1.0 / h1.shape[0]
    s1 = jnp.sum(h1, axis=0, keepdims=True)                             # (1, H1)
    s2 = jnp.sum(h1 * h1, axis=0, keepdims=True)                        # (1, H1)
    mean = s1 * inv_n
    var = s2 * inv_n - mean * mean          # E[x^2]-mean^2: slightly less stable, OK in f32
    scale = gamma * jax.lax.rsqrt(var + BN_EPS)                         # (1, H1)
    shift = beta - mean * scale
    # ReLU in f32 (v5e-friendly); bf16 cast for the MXU fused into the same expr.
    a1 = jnp.maximum(h1 * scale + shift, 0.0).astype(jnp.bfloat16)      # (B, H1) bf16

    # ---- fc_1m over cat([s, action], 1): split matmul as an accumulation chain ----
    act_bf = act_ref[...].astype(jnp.bfloat16)                          # (B, A)
    h2 = jnp.dot(a1, w2s, preferred_element_type=jnp.float32)           # (B, H2)
    h2 = h2 + jnp.dot(act_bf, w2a, preferred_element_type=jnp.float32)
    h2 = h2 + b2
    a2 = jnp.maximum(h2, 0.0)                                           # (B, H2) f32

    # ---- fc_2m (H2 -> 1): VPU broadcast-multiply + lane reduce, no MXU pass ----
    q = jnp.sum(a2 * w3_row, axis=-1, keepdims=True) + b3               # (B, 1)
    out_ref[...] = q.astype(out_ref.dtype)


@functools.partial(jax.jit, static_argnames=("hidden1", "hidden2"))
def critic_net_forward(state, action, wslab, vec, *, hidden1=256, hidden2=128):
    B, S = state.shape
    A = action.shape[1]
    # Packed-vec slicing assumes lane-aligned offsets.
    assert hidden1 % 128 == 0 and hidden2 % 128 == 0, "hidden sizes must be multiples of 128"
    s_pad = _round_up(S, 16)
    assert wslab.shape[0] >= s_pad + hidden1 + A
    assert vec.shape == (1, 2 * hidden1 + 2 * hidden2 + 128)

    kernel = functools.partial(
        critic_net_kernel, state_space=S, action_space=A,
        hidden1=hidden1, hidden2=hidden2, s_pad=s_pad)

    vmem = lambda: pl.BlockSpec(memory_space=pltpu.VMEM)
    return pl.pallas_call(
        kernel,
        out_shape=jax.ShapeDtypeStruct((B, 1), jnp.float32),
        in_specs=[vmem() for _ in range(4)],
        out_specs=vmem(),
    )(state, action, wslab, vec)


def init_params(key, state_space, action_space, hidden1=256, hidden2=128):
    """Mirror Critic_Net.reset_parameters:
         fc_1s.weight ~ U(+-1/sqrt(H1))  (weights_init_by_std uses weight.size()[0])
         fc_1m.weight ~ U(+-1/sqrt(H2))
         fc_2m.weight ~ U(-0.003, 0.003)
         biases keep default nn.Linear init U(+-1/sqrt(in_features)).
         BN: gamma=1, beta=0.  fc_1s bias omitted (cancelled by train-mode BN).
       Returns:
         wslab : (s_pad + H1 + a_pad, max(H1,H2)) bf16 — w1 rows [0:S], w2 rows
                 [s_pad : s_pad+H1+A] (action block zero-padded to a 16-row group).
         vec   : (1, 2*H1 + 2*H2 + 128) f32 — [gamma | beta | b_1m | fc_2m row | b_2m pad]."""
    ks = jax.random.split(key, 5)

    def unif(k, shape, bound):
        return jax.random.uniform(k, shape, jnp.float32, -bound, bound)

    H1, H2, S, A = hidden1, hidden2, state_space, action_space

    w1 = unif(ks[0], (S, H1), 1.0 / jnp.sqrt(jnp.float32(H1)))
    w2 = unif(ks[1], (H1 + A, H2), 1.0 / jnp.sqrt(jnp.float32(H2)))
    b2 = unif(ks[2], (H2,), 1.0 / jnp.sqrt(jnp.float32(H1 + A)))
    w3 = unif(ks[3], (H2, 1), 0.003)
    b3 = unif(ks[4], (1,), 1.0 / jnp.sqrt(jnp.float32(H2)))

    gamma = jnp.ones((H1,), jnp.float32)
    beta = jnp.zeros((H1,), jnp.float32)

    s_pad = _round_up(S, 16)
    a_pad = _round_up(A, 16)
    lane_w = max(H1, H2)
    rows = s_pad + H1 + a_pad

    slab = jnp.zeros((rows, lane_w), jnp.float32)
    slab = slab.at[:S, :H1].set(w1)
    slab = slab.at[s_pad:s_pad + H1 + A, :H2].set(w2)
    wslab = slab.astype(jnp.bfloat16)

    b3_blk = jnp.zeros((128,), jnp.float32).at[0].set(b3[0])
    vec = jnp.concatenate([gamma, beta, b2, w3[:, 0], b3_blk]).reshape(1, -1)

    return wslab, vec


if __name__ == "__main__":
    key = jax.random.PRNGKey(0)
    k_s, k_a, k_p = jax.random.split(key, 3)

    batch, state_space, action_space = 8, 16, 4
    hidden1, hidden2 = 256, 128

    state = jax.random.normal(k_s, (batch, state_space), jnp.float32)
    action = jax.random.uniform(k_a, (batch, action_space), jnp.float32, -1.0, 1.0)
    wslab, vec = init_params(k_p, state_space, action_space, hidden1, hidden2)

    q = critic_net_forward(state, action, wslab, vec, hidden1=hidden1, hidden2=hidden2)
    q = jax.block_until_ready(q)

    assert q.shape == (batch, 1)
    assert bool(jnp.all(jnp.isfinite(q)))

    print("KERNEL_OK")
</pallas_src>

<mosaic_0001>
module attributes {stable_mosaic.version = 11 : i64} {
  func.func @critic_net_kernel(%arg0: memref<8x16xf32, #tpu.memory_space<vmem>>, %arg1: memref<8x4xf32, #tpu.memory_space<vmem>>, %arg2: memref<288x256xbf16, #tpu.memory_space<vmem>>, %arg3: memref<1x896xf32, #tpu.memory_space<vmem>>, %arg4: memref<8x1xf32, #tpu.memory_space<vmem>>) attributes {dimension_semantics = [], scalar_prefetch = 0 : i64, scratch_operands = 0 : i64, tpu.core_type = #tpu.core_type<tc>} {
    %c0 = arith.constant 0 : index
    %c0_0 = arith.constant 0 : index
    %0 = vector.load %arg3[%c0, %c0_0] : memref<1x896xf32, #tpu.memory_space<vmem>>, vector<1x256xf32>
    %c0_1 = arith.constant 0 : index
    %c256 = arith.constant 256 : index
    %1 = vector.load %arg3[%c0_1, %c256] : memref<1x896xf32, #tpu.memory_space<vmem>>, vector<1x256xf32>
    %c0_2 = arith.constant 0 : index
    %c512 = arith.constant 512 : index
    %2 = vector.load %arg3[%c0_2, %c512] : memref<1x896xf32, #tpu.memory_space<vmem>>, vector<1x128xf32>
    %c0_3 = arith.constant 0 : index
    %c640 = arith.constant 640 : index
    %3 = vector.load %arg3[%c0_3, %c640] : memref<1x896xf32, #tpu.memory_space<vmem>>, vector<1x128xf32>
    %c0_4 = arith.constant 0 : index
    %c768 = arith.constant 768 : index
    %4 = vector.load %arg3[%c0_4, %c768] : memref<1x896xf32, #tpu.memory_space<vmem>>, vector<1x1xf32>
    %c0_5 = arith.constant 0 : index
    %c0_6 = arith.constant 0 : index
    %5 = vector.load %arg2[%c0_5, %c0_6] : memref<288x256xbf16, #tpu.memory_space<vmem>>, vector<16x256xbf16>
    %c16 = arith.constant 16 : index
    %c0_7 = arith.constant 0 : index
    %6 = vector.load %arg2[%c16, %c0_7] : memref<288x256xbf16, #tpu.memory_space<vmem>>, vector<256x128xbf16>
    %c272 = arith.constant 272 : index
    %c0_8 = arith.constant 0 : index
    %7 = vector.load %arg2[%c272, %c0_8] : memref<288x256xbf16, #tpu.memory_space<vmem>>, vector<4x128xbf16>
    %c0_9 = arith.constant 0 : index
    %c0_10 = arith.constant 0 : index
    %8 = vector.load %arg0[%c0_9, %c0_10] : memref<8x16xf32, #tpu.memory_space<vmem>>, vector<8x16xf32>
    %9 = arith.truncf %8 : vector<8x16xf32> to vector<8x16xbf16>
    %cst = arith.constant dense<0.000000e+00> : vector<8x256xf32>
    %10 = tpu.matmul %9, %5, %cst {dimension_numbers = #tpu.dot_dimension_numbers<[1], [0], [0], [1], [0, 0, 1, 1], [], []>} : vector<8x16xbf16>, vector<16x256xbf16>, vector<8x256xf32> -> vector<8x256xf32>
    %cst_11 = arith.constant dense<0.000000e+00> : vector<256xf32>
    %11 = vector.multi_reduction <add>, %10, %cst_11 [0] : vector<8x256xf32> to vector<256xf32>
    %12 = vector.shape_cast %11 : vector<256xf32> to vector<1x256xf32>
    %13 = arith.mulf %10, %10 : vector<8x256xf32>
    %cst_12 = arith.constant dense<0.000000e+00> : vector<256xf32>
    %14 = vector.multi_reduction <add>, %13, %cst_12 [0] : vector<8x256xf32> to vector<256xf32>
    %15 = vector.shape_cast %14 : vector<256xf32> to vector<1x256xf32>
    %cst_13 = arith.constant 1.250000e-01 : f32
    %16 = vector.broadcast %cst_13 : f32 to vector<1x256xf32>
    %17 = arith.mulf %12, %16 : vector<1x256xf32>
    %cst_14 = arith.constant 1.250000e-01 : f32
    %18 = vector.broadcast %cst_14 : f32 to vector<1x256xf32>
    %19 = arith.mulf %15, %18 : vector<1x256xf32>
    %20 = arith.mulf %17, %17 : vector<1x256xf32>
    %21 = arith.subf %19, %20 : vector<1x256xf32>
    %cst_15 = arith.constant 9.99999974E-6 : f32
    %22 = vector.broadcast %cst_15 : f32 to vector<1x256xf32>
    %23 = arith.addf %21, %22 : vector<1x256xf32>
    %24 = math.rsqrt %23 : vector<1x256xf32>
    %25 = arith.mulf %0, %24 : vector<1x256xf32>
    %26 = arith.mulf %17, %25 : vector<1x256xf32>
    %27 = arith.subf %1, %26 : vector<1x256xf32>
    %28 = vector.broadcast %25 : vector<1x256xf32> to vector<8x256xf32>
    %29 = arith.mulf %10, %28 : vector<8x256xf32>
    %30 = vector.broadcast %27 : vector<1x256xf32> to vector<8x256xf32>
    %31 = arith.addf %29, %30 : vector<8x256xf32>
    %cst_16 = arith.constant 0.000000e+00 : f32
    %32 = vector.broadcast %cst_16 : f32 to vector<8x256xf32>
    %33 = arith.maximumf %31, %32 : vector<8x256xf32>
    %34 = arith.truncf %33 : vector<8x256xf32> to vector<8x256xbf16>
    %c0_17 = arith.constant 0 : index
    %c0_18 = arith.constant 0 : index
    %35 = vector.load %arg1[%c0_17, %c0_18] : memref<8x4xf32, #tpu.memory_space<vmem>>, vector<8x4xf32>
    %36 = arith.truncf %35 : vector<8x4xf32> to vector<8x4xbf16>
    %cst_19 = arith.constant dense<0.000000e+00> : vector<8x128xf32>
    %37 = tpu.matmul %34, %6, %cst_19 {dimension_numbers = #tpu.dot_dimension_numbers<[1], [0], [0], [1], [0, 0, 1, 1], [], []>} : vector<8x256xbf16>, vector<256x128xbf16>, vector<8x128xf32> -> vector<8x128xf32>
    %cst_20 = arith.constant dense<0.000000e+00> : vector<8x128xf32>
    %38 = tpu.matmul %36, %7, %cst_20 {dimension_numbers = #tpu.dot_dimension_numbers<[1], [0], [0], [1], [0, 0, 1, 1], [], []>} : vector<8x4xbf16>, vector<4x128xbf16>, vector<8x128xf32> -> vector<8x128xf32>
    %39 = arith.addf %37, %38 : vector<8x128xf32>
    %40 = vector.broadcast %2 : vector<1x128xf32> to vector<8x128xf32>
    %41 = arith.addf %39, %40 : vector<8x128xf32>
    %cst_21 = arith.constant 0.000000e+00 : f32
    %42 = vector.broadcast %cst_21 : f32 to vector<8x128xf32>
    %43 = arith.maximumf %41, %42 : vector<8x128xf32>
    %44 = vector.broadcast %3 : vector<1x128xf32> to vector<8x128xf32>
    %45 = arith.mulf %43, %44 : vector<8x128xf32>
    %cst_22 = arith.constant dense<0.000000e+00> : vector<8xf32>
    %46 = vector.multi_reduction <add>, %45, %cst_22 [1] : vector<8x128xf32> to vector<8xf32>
    %47 = vector.shape_cast %46 : vector<8xf32> to vector<8x1xf32>
    %48 = vector.broadcast %4 : vector<1x1xf32> to vector<8x1xf32>
    %49 = arith.addf %47, %48 : vector<8x1xf32>
    %c0_23 = arith.constant 0 : index
    %c0_24 = arith.constant 0 : index
    %50 = vector.load %arg4[%c0_23, %c0_24] : memref<8x1xf32, #tpu.memory_space<vmem>>, vector<8x1xf32>
    tpu.vector_store %arg4[%c0_23, %c0_24], %49 {strides = array<i32>} : memref<8x1xf32, #tpu.memory_space<vmem>>, vector<8x1xf32>,
    return
  }
}

</mosaic_0001>

<bundles_post_ra>
// kernel: critic_net_forward.1
= control target key start
LH: loop header
LB: loop body
LE: loop exit
PB: predicated region body
PF: predicated region fallthrough
CT: control target
= control target key end

     0   :  { %9 = vsyncpa [#allocation3], 0  ;;  %s559_s15 = smov [#allocation2]   ;;  %s632_s0 = inlined_call_operand.vmem [shape: f32[8,16], index: 0, kind: input, shape index: {}]   ;;  %s633_s1 = inlined_call_operand.vmem [shape: f32[8,4], index: 1, kind: input, shape index: {}]   ;;  %s634_s2 = inlined_call_operand.hbm [shape: bf16[288,256], index: 2, kind: input, shape index: {}]   ;;  %s635_s3 = inlined_call_operand.vmem [shape: f32[1,896], index: 3, kind: input, shape index: {}]   ;;  %s636_s4 = inlined_call_operand.vmem [shape: f32[8,1], index: 4, kind: output, shape index: {}]  }
   0x1   :  { %s19_s16 = sshll.u32 %s559_s15, 4  ;;  %s20_s16 = int_to_ptr.vmem [resolvable:$true] %s19_s16 }
   0x2   :  { %s545_s17 = scalar_lea.vmem %s20_s16, 4608  ;;  %p550_p1 = scmp.lt.s32.totalorder %s20_s16, %s20_s16 }
   0x3   :  { %p546_p0 = scmp.ne.s32.totalorder %s20_s16, %s545_s17  ;;  %p551_p2 = scmp.lt.s32.totalorder %s545_s17, %s545_s17 }
   0x5   :  { %p552_p3 = por %p551_p2, %p550_p1 }
   0x7   :  { %p553_p4 = pnand %p552_p3, %p546_p0 }
   0x9   :  { %556 = shalt.err (!%p553_p4)
}
   0xa   :  { %s560_s18 = smov 128   ;;  %s561_s19 = smov 8  }
   0xb   :  { %25 = dma.hbm_to_vmem [thread:$0]  %s634_s2, 4608, %s20_s16, [#allocation3], %s560_s18, %s560_s18, %s561_s19  }
   0xc   :  { %557 = dma.done.wait [#allocation3], 4608  }
   0xd   :  { %558 = vsyncadd [#allocation3], 4294962688  ;;  %v562_v0 = vmov 0   ;;  %v514_v1 = vld [vmem:[#allocation2 + $0x4] ss:$8 sps:$4 sm:$0xff]   ;;  %vm84_vm0 = vcmask 130048  }
   0xe   :  { %120 = vmatprep.mubr.bf16.mxu1 %v562_v0  ;;  %v516_v2 = vld [vmem:[#allocation2] ss:$8 sps:$4 sm:$0xff]   ;;  %102 = vmatprep.subr.bf16.mxu1 %v514_v1  ;;  %v519_v7 = vld [vmem:[#allocation2 + $0xf0] ss:$8 sps:$4 sm:$0xff]   ;;  %vm243_vm1 = vcmask 1041408   ;;  %v563_v10 = vmov 0.0  }
   0xf   :  { %v72_v3 = vld [vmem:[%s632_s0] sm:$0xff]  ;;  %103 = vmatpush1.bf16.msra.mxu1 %v516_v2  ;;  %v520_v8 = vld [vmem:[#allocation2 + $0x70] ss:$8 sps:$4 sm:$0xff]   ;;  %vm564_vm2 = vmmov 0   ;;  %vm239_vm3 = vcmask 31744   ;;  %vm447_vm4 = vcmask 7168  }
  0x10   :  { %v73_v4 = vpack.c.bf16 %v72_v3, %v72_v3  ;;  %v517_v5 = vld [vmem:[#allocation2 + $0x100] ss:$8 sps:$4 sm:$0xff]   ;;  %501 = vmatprep.subr.bf16.mxu1 %v563_v10  ;;  %v71_v11 = vld [vmem:[#allocation2 + $0x110] sm:$0x3]  ;;  %v565_v2 = vmov 1966171168  }
  0x11   :  { %v518_v6 = vld [vmem:[#allocation2 + $0x80] ss:$8 sps:$4 sm:$0xff]   ;;  %479 = vmatprep.subr.bf16.mxu0 %v517_v5  ;;  %v245_v13 = vsel %vm243_vm1, %v71_v11, 0  ;;  %v523_v16 = vld [vmem:[#allocation2 + $0xd0] ss:$8 sps:$4 sm:$0xff]   ;;  %v171_v3 = vunpack.c.l.s4 %v565_v2 }
  0x12   :  { %456 = vmatmul.mubr.msk.bf16.vlgmr.msra.gmra.mxu1 %vm84_vm0, %v73_v4  ;;  %480 = vmatpush3.bf16.msra.mxu0 %v518_v6  ;;  %v521_v9 = vld [vmem:[#allocation2 + $0xe0] ss:$8 sps:$4 sm:$0xff]   ;;  %v524_v17 = vld [vmem:[#allocation2 + $0x50] ss:$8 sps:$4 sm:$0xff]   ;;  %v173_v4 = vlaneseq }
  0x13   :  { %481 = vmatprep.subr.bf16.mxu0 %v519_v7  ;;  %v237_v12 = vld [vmem:[%s633_s1] sm:$0xff]  ;;  %503 = vmatprep.mubr.msk.bf16.mxu1 %vm564_vm2, %v563_v10  ;;  %v527_v20 = vld [vmem:[#allocation2 + $0xb0] ss:$8 sps:$4 sm:$0xff]   ;;  %v172_v5 = vunpack.c.0.s8 %v171_v3 }
  0x14   :  { %v238_v14 = vpack.c.bf16 %v237_v12, %v237_v12  ;;  %v522_v15 = vld [vmem:[#allocation2 + $0x60] ss:$8 sps:$4 sm:$0xff]   ;;  %502 = vmatpush3.bf16.msra.mxu1 %v245_v13  ;;  %v528_v21 = vld [vmem:[#allocation2 + $0x30] ss:$8 sps:$4 sm:$0xff]   ;;  %v174_v6 = vshrl.u32 %v173_v4, 7 }
  0x15   :  { %v525_v18 = vld [vmem:[#allocation2 + $0xc0] ss:$8 sps:$4 sm:$0xff]   ;;  %v531_v24 = vld [vmem:[#allocation2 + $0x90] ss:$8 sps:$4 sm:$0xff]  }
  0x16   :  { %482 = vmatpush3.bf16.msra.mxu0 %v520_v8  ;;  %v526_v19 = vld [vmem:[#allocation2 + $0x40] ss:$8 sps:$4 sm:$0xff]   ;;  %v532_v25 = vld [vmem:[#allocation2 + $0x10] ss:$8 sps:$4 sm:$0xff]   ;;  %v175_v8 = vsub.s32 %v172_v5, %v174_v6 }
  0x17   :  { %483 = vmatprep.subr.bf16.mxu0 %v521_v9  ;;  %v529_v22 = vld [vmem:[#allocation2 + $0xa0] ss:$8 sps:$4 sm:$0xff]  }
  0x18   :  { %v530_v23 = vld [vmem:[#allocation2 + $0x20] ss:$8 sps:$4 sm:$0xff]  }
  0x19   :  { %v32_v12 = vld [vmem:[%s635_s3] sm:$0x3] }
  0x1a   :  { %504 = vmatmul.mubr.msk.bf16.vlgmr.msra.gmra.mxu1 %vm239_vm3, %v238_v14  ;;  %484 = vmatpush3.bf16.msra.mxu0 %v522_v15  ;;  %v189_v14 = vsub.s32 0, %v174_v6  ;;  %v193_v15 = vsub.s32 1, %v174_v6 }
  0x1b   :  { %485 = vmatprep.subr.bf16.mxu0 %v523_v16 }
  0x1e   :  { %486 = vmatpush3.bf16.msra.mxu0 %v524_v17 }
  0x1f   :  { %487 = vmatprep.subr.bf16.mxu0 %v525_v18 }
  0x22   :  { %488 = vmatpush3.bf16.msra.mxu0 %v526_v19 }
  0x23   :  { %489 = vmatprep.subr.bf16.mxu0 %v527_v20 }
  0x26   :  { %490 = vmatpush3.bf16.msra.mxu0 %v528_v21 }
  0x27   :  { %491 = vmatprep.subr.bf16.mxu0 %v529_v22 }
  0x2a   :  { %492 = vmatpush3.bf16.msra.mxu0 %v530_v23  ;;  %v33_v23 = vld [vmem:[%s635_s3 + $0x2] sm:$0x3] }
  0x2b   :  { %493 = vmatprep.subr.bf16.mxu0 %v531_v24 }
  0x2e   :  { %494 = vmatpush3.bf16.msra.mxu0 %v532_v25 }
  0xd2   :  { %v600_v26 = vpop.f32.mrf.mxu1 }
  0xd3   :  { %v129_v27 = vrot.slane %v600_v26, 4  ;;  %v141_v28 = vmul.f32 %v600_v26, %v600_v26 }
  0xd4   :  { %v605_v29 = vpop.f32.mrf.mxu1 }
  0xd5   :  { %v130_v30 = vadd.f32 %v129_v27, %v600_v26  ;;  %v143_v31 = vrot.slane %v141_v28, 4  ;;  %v135_v32 = vrot.slane %v605_v29, 4  ;;  %v142_v33 = vmul.f32 %v605_v29, %v605_v29 }
  0xd6   :  { %v126_v34 = vpop.f32.mrf.mxu1 }
  0xd7   :  { %v131_v35 = vrot.slane %v130_v30, 2  ;;  %v144_v36 = vadd.f32 %v143_v31, %v141_v28  ;;  %v136_v37 = vadd.f32 %v135_v32, %v605_v29  ;;  %v149_v38 = vrot.slane %v142_v33, 4 }
  0xd8   :  { %v127_v39 = vpop.f32.mrf.mxu1 }
  0xd9   :  { %v132_v40 = vadd.f32 %v131_v35, %v130_v30  ;;  %v145_v41 = vrot.slane %v144_v36, 2  ;;  %v137_v42 = vrot.slane %v136_v37, 2  ;;  %v150_v43 = vadd.f32 %v149_v38, %v142_v33 }
  0xda   :  { %v281_v38 = vpop.f32.mrf.mxu1 }
  0xdb   :  { %v133_v44 = vrot.slane %v132_v40, 1  ;;  %v146_v45 = vadd.f32 %v145_v41, %v144_v36  ;;  %v138_v46 = vadd.f32 %v137_v42, %v136_v37  ;;  %v151_v47 = vrot.slane %v150_v43, 2 }
  0xdc   :  { %v505_v39 = vpop.f32.mrf.mxu1 }
  0xdd   :  { %v134_v48 = vadd.f32 %v133_v44, %v132_v40  ;;  %v147_v49 = vrot.slane %v146_v45, 1  ;;  %v139_v50 = vrot.slane %v138_v46, 1  ;;  %v152_v51 = vadd.f32 %v151_v47, %v150_v43 }
  0xde   :  { %v284_v40 = vpop.f32.mrf.mxu1 }
  0xdf   :  { %v148_v52 = vadd.f32 %v147_v49, %v146_v45  ;;  %v155_v53 = vmul.f32 0.125, %v134_v48  ;;  %v153_v54 = vrot.slane %v152_v51, 1  ;;  %v140_v55 = vadd.f32 %v139_v50, %v138_v46  ;;  %v475_v48 = vld [vmem:[%s635_s3 + $0x5] ss:$0 sm:$0xff] }
  0xe0   :  { %v506_v41 = vpop.f32.mrf.mxu1 }
  0xe1   :  { %v157_v56 = vmul.f32 0.125, %v148_v52  ;;  %v159_v57 = vmul.f32 %v155_v53, %v155_v53  ;;  %v154_v58 = vadd.f32 %v153_v54, %v152_v51  ;;  %v156_v59 = vmul.f32 0.125, %v140_v55  ;;  %v476_v51 = vld [vmem:[%s635_s3 + $0x6] ss:$0 sm:$0xff] }
  0xe3   :  { %v161_v60 = vsub.f32 %v157_v56, %v159_v57  ;;  %v158_v61 = vmul.f32 0.125, %v154_v58  ;;  %v160_v62 = vmul.f32 %v156_v59, %v156_v59 }
  0xe5   :  { %v163_v63 = vadd.f32 1e-05, %v161_v60  ;;  %v162_v0 = vsub.f32 %v158_v61, %v160_v62 }
  0xe7   :  { %v164_v1 = vadd.f32 1e-05, %v162_v0  ;;  %533 = vrsqrt.f32 %v163_v63 }
  0xe9   :  { %535 = vrsqrt.f32 %v164_v1 }
  0xf4   :  { %v534_v7 = vpop.eup %533 }
  0xf6   :  { %v536_v9 = vpop.eup %535 }
  0xf7   :  { %v169_v10 = vcombine.low %v534_v7, %v536_v9 }
  0xf9   :  { %v176_v11 = vrot.slane %v169_v10, %v175_v8 }
  0xfb   :  { %v183_v13 = vrot.slane %v176_v11, %v175_v8 }
  0xfd   :  { %v185_v16 = vmul.f32 %v183_v13, %v32_v12 }
  0xff   :  { %v190_v17 = vrot.slane %v185_v16, %v189_v14  ;;  %v194_v18 = vrot.slane %v185_v16, %v193_v15 }
 0x101   :  { %v197_v19 = vmul.f32 %v190_v17, %v155_v53  ;;  %v198_v20 = vmul.f32 %v194_v18, %v156_v59  ;;  %v219_v27 = vmul.f32 %v194_v18, %v605_v29  ;;  %v218_v30 = vmul.f32 %v190_v17, %v600_v26  ;;  %v474_v26 = vld [vmem:[%s635_s3 + $0x4] ss:$0 sm:$0xff] }
 0x103   :  { %v201_v21 = vcombine.low %v197_v19, %v198_v20 }
 0x105   :  { %v208_v22 = vrot.slane %v201_v21, %v175_v8 }
 0x107   :  { %v215_v24 = vrot.slane %v208_v22, %v175_v8 }
 0x109   :  { %v217_v25 = vsub.f32 %v33_v23, %v215_v24 }
 0x10b   :  { %v228_v28 = vrot.slane %v217_v25, %v193_v15  ;;  %v224_v31 = vrot.slane %v217_v25, %v189_v14 }
 0x10d   :  { %v232_v32 = vadd.f32 %v228_v28, %v219_v27  ;;  %v231_v33 = vadd.f32 %v224_v31, %v218_v30 }
 0x10f   :  { %v234_v34 = vmax.f32 %v232_v32, 0.0  ;;  %v233_v35 = vmax.f32 %v231_v33, 0.0 }
 0x111   :  { %v236_v36 = vpack.c.bf16 %v234_v34, %v234_v34  ;;  %v235_v37 = vpack.c.bf16 %v233_v35, %v233_v35 }
 0x113   :  { %415 = vmatprep.mubr.bf16.mxu0 %v236_v36 }
 0x114   :  { %416 = vmatmul.mubr.bf16.vlgmr.msra.gmra.mxu0 %v235_v37 }
 0x1d4   :  { %v495_v42 = vpop.f32.mrf.mxu0 }
 0x1d6   :  { %v496_v43 = vpop.f32.mrf.mxu0 }
 0x1d7   :  { %v497_v44 = vadd.f32 %v496_v43, %v495_v42 }
 0x1d8   :  { %v498_v29 = vpop.f32.mrf.mxu0 }
 0x1d9   :  { %v418_v45 = vadd.f32 %v497_v44, %v281_v38 }
 0x1da   :  { %v499_v46 = vpop.f32.mrf.mxu0 }
 0x1db   :  { %v429_v47 = vadd.f32 %v474_v26, %v418_v45 }
 0x1dd   :  { %v430_v49 = vmax.f32 %v429_v47, 0.0 }
 0x1df   :  { %v437_v50 = vmul.f32 %v475_v48, %v430_v49 }
 0x1e1   :  { %438 = vadd.xlane.f32.xlu0 %v437_v50 }
 0x26a   :  { %v439_v52 = vpop.xlane.xlu0 %438 }
 0x26b   :  { %v446_v53 = vadd.f32 %v476_v51, %v439_v52 }
 0x26d   :  { %448 = vst.msk [vmem:[%s636_s4] sm:$0xff] %vm447_vm4, %v446_v53 }
 0x26e   :  { %453 = vsyncpa [#allocation3], 1 }

</bundles_post_ra>
